<compile_context>
chip_gen: v6e
topology: v6e:2x2x1
jax: 0.10.0
libtpu: 0.0.40
codegen_flags: <defaults>
</compile_context>

<pallas_src>
import functools

import jax
import jax.numpy as jnp
from jax.experimental import pallas as pl
from jax.experimental.pallas import tpu as pltpu


def _identity_dma_kernel(chunk_rows, x_ref, o_ref, sems):
    """One direct HBM->HBM DMA per grid step, over this step's row chunk."""
    i = pl.program_id(0)
    start = pl.multiple_of(i * chunk_rows, chunk_rows)
    cp = pltpu.make_async_copy(
        x_ref.at[pl.ds(start, chunk_rows), :],
        o_ref.at[pl.ds(start, chunk_rows), :],
        sems.at[i],
    )
    cp.start()
    cp.wait()


def _pick_num_chunks(rows: int, row_bytes: int,
                     *, max_chunks: int = 8,
                     min_chunk_bytes: int = 1 << 20) -> int:
    """Largest chunk count <= max_chunks that divides `rows` evenly while
    keeping each DMA >= min_chunk_bytes (tiny tensors -> a single DMA)."""
    total = rows * row_bytes
    best = 1
    for c in range(2, max_chunks + 1):
        if rows % c == 0 and total // c >= min_chunk_bytes:
            best = c
    return best


def conv2d_placeholder_forward(x: jax.Array) -> jax.Array:
    """Identity forward pass of the placeholder Conv2D module via Pallas."""
    orig_shape = x.shape
    n = x.size
    if n == 0:
        return x  # nothing to copy

    # Lane-dense 2-D view of the contiguous tensor (metadata-only reshape);
    # falls back to an (n, 1) view when n is not a multiple of 128 — the DMA
    # path has no lane-alignment requirement, it just moves bytes.
    lane = 128 if n % 128 == 0 else 1
    rows = n // lane
    flat = x.reshape(rows, lane)

    itemsize = jnp.dtype(x.dtype).itemsize
    num_chunks = _pick_num_chunks(rows, lane * itemsize)
    chunk_rows = rows // num_chunks

    out = pl.pallas_call(
        functools.partial(_identity_dma_kernel, chunk_rows),
        out_shape=jax.ShapeDtypeStruct((rows, lane), x.dtype),
        grid=(num_chunks,),
        in_specs=[pl.BlockSpec(memory_space=pl.ANY)],
        out_specs=pl.BlockSpec(memory_space=pl.ANY),
        scratch_shapes=[pltpu.SemaphoreType.DMA((num_chunks,))],
        compiler_params=pltpu.CompilerParams(
            dimension_semantics=("parallel",)),
        cost_estimate=pl.CostEstimate(
            flops=0, transcendentals=0, bytes_accessed=2 * n * itemsize),
    )(flat)

    return out.reshape(orig_shape)


if __name__ == "__main__":
    key = jax.random.PRNGKey(0)
    # NCHW input, consistent with PyTorch conv conventions.
    x = jax.random.normal(key, (2, 4, 16, 16), dtype=jnp.float32)

    y = conv2d_placeholder_forward(x)
    y = jax.block_until_ready(y)

    assert y.shape == x.shape and y.dtype == x.dtype
    assert bool(jnp.array_equal(y, x))
    print("KERNEL_OK")
</pallas_src>

<mosaic_0001>
module attributes {stable_mosaic.version = 11 : i64} {
  func.func @_identity_dma_kernel(%arg0: i32, %arg1: memref<16x128xf32, #tpu.memory_space<any>>, %arg2: memref<16x128xf32, #tpu.memory_space<any>>, %arg3: memref<1x!tpu.dma_semaphore, #tpu.memory_space<semaphore_mem>>) attributes {dimension_semantics = [#tpu.dimension_semantics<parallel>], iteration_bounds = array<i64: 1>, scalar_prefetch = 0 : i64, scratch_operands = 1 : i64, tpu.core_type = #tpu.core_type<tc>, window_params = [{}, {}]} {
    %c16_i32 = arith.constant 16 : i32
    %0 = arith.muli %arg0, %c16_i32 : i32
    %1 = tpu.assume_multiple %0, 16 : i32
    %c0_i32 = arith.constant 0 : i32
    %2 = tpu.memref_slice %arg1[%1, %c0_i32] : memref<16x128xf32, #tpu.memory_space<any>> -> memref<16x128xf32, #tpu.memory_space<any>>
    %c0_i32_0 = arith.constant 0 : i32
    %3 = tpu.memref_slice %arg2[%1, %c0_i32_0] : memref<16x128xf32, #tpu.memory_space<any>> -> memref<16x128xf32, #tpu.memory_space<any>>
    %4 = tpu.memref_slice %arg3[%arg0] : memref<1x!tpu.dma_semaphore, #tpu.memory_space<semaphore_mem>> -> memref<1x!tpu.dma_semaphore, #tpu.memory_space<semaphore_mem>>
    %5 = tpu.memref_squeeze %4 : memref<1x!tpu.dma_semaphore, #tpu.memory_space<semaphore_mem>> -> memref<!tpu.dma_semaphore, #tpu.memory_space<semaphore_mem>>
    tpu.enqueue_dma source(%2 : memref<16x128xf32, #tpu.memory_space<any>>) target(%3 : memref<16x128xf32, #tpu.memory_space<any>>) target_semaphore(%5 : memref<!tpu.dma_semaphore, #tpu.memory_space<semaphore_mem>>)
    %c0_i32_1 = arith.constant 0 : i32
    %6 = tpu.memref_slice %arg1[%1, %c0_i32_1] : memref<16x128xf32, #tpu.memory_space<any>> -> memref<16x128xf32, #tpu.memory_space<any>>
    %c0_i32_2 = arith.constant 0 : i32
    %7 = tpu.memref_slice %arg2[%1, %c0_i32_2] : memref<16x128xf32, #tpu.memory_space<any>> -> memref<16x128xf32, #tpu.memory_space<any>>
    %8 = tpu.memref_slice %arg3[%arg0] : memref<1x!tpu.dma_semaphore, #tpu.memory_space<semaphore_mem>> -> memref<1x!tpu.dma_semaphore, #tpu.memory_space<semaphore_mem>>
    %9 = tpu.memref_squeeze %8 : memref<1x!tpu.dma_semaphore, #tpu.memory_space<semaphore_mem>> -> memref<!tpu.dma_semaphore, #tpu.memory_space<semaphore_mem>>
    tpu.wait_dma2 semaphore(%9 : memref<!tpu.dma_semaphore, #tpu.memory_space<semaphore_mem>>) src(%6 : memref<16x128xf32, #tpu.memory_space<any>>) dst(%7 : memref<16x128xf32, #tpu.memory_space<any>>)
    return
  }
}

</mosaic_0001>

<bundles_post_ra>
// kernel: tpu_custom_call.1
= control target key start
LH: loop header
LB: loop body
LE: loop exit
PB: predicated region body
PF: predicated region fallthrough
CT: control target
= control target key end

     0   :  { %s33_s6 = smov [#allocation2]   ;;  %s34_s7 = smov 131072   ;;  %s52_s0 = inlined_call_operand.hbm [shape: f32[16,128], index: 0, kind: input, shape index: {}]   ;;  %s53_s1 = inlined_call_operand.hbm [shape: f32[16,128], index: 1, kind: output, shape index: {}]  }
   0x1   :  { %s35_s8 = smov 0  }
   0x2   :  { %17 = dma.general %s52_s0, 256, %s53_s1, %s33_s6, %s34_s7, [#allocation4], %s35_s8, 0  }
   0x3   :  { %31 = dma.done.wait [#allocation2], 256 }
   0x4   :  { %32 = vsyncadd [#allocation2], 4294967040 }
   0x5   :  { %21 = vsyncmov [#allocation2] }
   0x8   :  { %s22_s13 = vpop.sfrf %21 }
   0x9   :  { %p27_p0 = scmp.ne.s32.totalorder %s22_s13, 0 }
   0xb   :  { %26 = shalt.err (%p27_p0)  }

</bundles_post_ra>
